<compile_context>
chip_gen: v7x
topology: tpu7x:2x2x1
jax: 0.10.0
libtpu: 0.0.40
codegen_flags: <defaults>
</compile_context>

<pallas_src>
import functools
import numpy as np
import jax
import jax.numpy as jnp
from jax import lax
from jax.experimental import pallas as pl
from jax.experimental.pallas import tpu as pltpu

# ----------------------------- model config ---------------------------------
SELF_TP_RANK_MAX = 2
BASIS_RANK_MAX = 2
FEATURE_RANK_MAX = 2
NUM_LAYERS = 2
NU_MAX = 2
DIM = 3
N_CHANNELS = 4          # in_dim
OUT_DIM = 2
R_CUT = 2.0             # TODO(synk): exact e_rbf cutoff/envelope not in the provided source; plain Bessel RBF used.

RANK_MAX = FEATURE_RANK_MAX
COMP_LEN = [1] + [DIM ** c for c in range(1, RANK_MAX + 1)]      # [1, 3, 9]
L = int(sum(COMP_LEN))                                           # 13 components / channel
F = L * N_CHANNELS                                               # 52 real feature columns
FP = 128                                                         # lane-padded feature width
OUT_PAD = 128                                                    # lane-padded head width
OFFSETS = np.concatenate([[0], np.cumsum(COMP_LEN)])[:-1].astype(int)
RANK_OF_COMP = np.concatenate([np.full(COMP_LEN[c], c) for c in range(RANK_MAX + 1)])


# ------------------------------ Pallas kernel --------------------------------
def _lane_tile(x, ch_of_col, n_ch):
    """VPU broadcast: out[:, comp*n_ch + ch] = x[:, ch] for every component.

    Only columns 0..n_ch-1 of x are read.  Implemented with a lane iota and
    nested selects so the broadcast never touches the MXU."""
    out = x[:, n_ch - 1:n_ch]
    for ch in range(n_ch - 2, -1, -1):
        out = jnp.where(ch_of_col == ch, x[:, ch:ch + 1], out)
    return out


def fused_mace_kernel(edge_attr_ref, s_ref, r_ref, h_init_ref,
                      wb_basis_ref, wb_ws_ref, cw_ref, mw_ref,
                      pred_w_ref, pred_b_ref,
                      out_ref, h_ref, *, n_ch, nu_max):
    """All CartesianMACE layers + global_add_pool + Linear head in one kernel.

    grid = (NUM_LAYERS,) ("arbitrary"): h_ref (VMEM scratch) carries the node
    features from layer to layer, per-layer weights are selected by the
    BlockSpec index_maps, and the pooled prediction is written on the last
    grid step only."""
    f32, bf16 = jnp.float32, jnp.bfloat16
    layer = pl.program_id(0)

    @pl.when(layer == 0)
    def _init():
        h_ref[...] = h_init_ref[...]

    h = h_ref[...]                      # (Np, FP) f32, resident across layers
    S = s_ref[...]                      # (Ep, Np) bf16 one-hot senders
    R = r_ref[...]                      # (Np, Ep) bf16 one-hot receivers (transposed)
    edge_attr = edge_attr_ref[...]      # (Ep, FP) f32, layer-invariant (hoisted)

    ch_of_col = lax.broadcasted_iota(jnp.int32, (1, FP), 1) % n_ch

    # ----- AtomicBasis (reconstructed) -----
    # TODO(synk): AtomicBasis source not provided; reconstructed as
    #   A_i = W_c . sum_{j->i} (edge_attr_ij * h^(0)_j), using only the rank-0
    #   node scalars (h_rank_max handling for deeper ranks is omitted).
    h0_t = _lane_tile(h, ch_of_col, n_ch)                                # VPU broadcast
    h_send = jnp.dot(S, h0_t.astype(bf16), preferred_element_type=f32)   # gather senders
    msg_edge = edge_attr * h_send
    A = jnp.dot(R, msg_edge.astype(bf16), preferred_element_type=f32)    # scatter-sum
    A = jnp.dot(A.astype(bf16), wb_basis_ref[0], preferred_element_type=f32)  # channel mix

    # ----- WeightedSum (reconstructed) -----
    # TODO(synk): WeightedSum source not provided; reconstructed as
    #   m = sum_{nu=1..nu_max} W_nu . (A^(0)^(nu-1) * A).
    msgs = jnp.dot(A.astype(bf16), wb_ws_ref[0, 0:FP, :],
                   preferred_element_type=f32)                           # nu = 1
    p = A[:, :n_ch]
    for nu in range(2, nu_max + 1):
        scaled = A * _lane_tile(p, ch_of_col, n_ch)                      # VPU broadcast
        msgs = msgs + jnp.dot(scaled.astype(bf16),
                              wb_ws_ref[0, (nu - 1) * FP:nu * FP, :],
                              preferred_element_type=f32)
        if nu < nu_max:
            p = p * A[:, :n_ch]

    # ----- update (MACE eq. 11: einsum 'ij,kj...->kj...' reduces to a
    #        per-channel column-sum scaling) -----
    h_new = cw_ref[0] * h + mw_ref[0] * msgs
    h_ref[...] = h_new

    # ----- global_add_pool + Linear head, emitted on the last layer only -----
    # TODO(synk): pooling assumes a single graph (batch indices all zero), as in
    # the single-neighbourhood forward of the reference module.
    @pl.when(layer == pl.num_programs(0) - 1)
    def _head():
        pooled = jnp.sum(h_new, axis=0, keepdims=True)                   # (1, FP)
        out_ref[...] = (jnp.dot(pooled.astype(bf16), pred_w_ref[...],
                                preferred_element_type=f32) + pred_b_ref[...])


# ------------------------------ wrappers -------------------------------------
def _fused_mace_call(edge_attr, S, R, h_init, layer_params, pred_w, pred_b):
    n_edges_p, fp = edge_attr.shape
    n_nodes_p = h_init.shape[0]
    kernel = functools.partial(fused_mace_kernel, n_ch=N_CHANNELS, nu_max=NU_MAX)
    grid_spec = pltpu.PrefetchScalarGridSpec(
        num_scalar_prefetch=0,
        grid=(NUM_LAYERS,),
        in_specs=[
            pl.BlockSpec((n_edges_p, fp), lambda l: (0, 0)),             # edge_attr (resident)
            pl.BlockSpec((n_edges_p, n_nodes_p), lambda l: (0, 0)),      # S         (resident)
            pl.BlockSpec((n_nodes_p, n_edges_p), lambda l: (0, 0)),      # R         (resident)
            pl.BlockSpec((n_nodes_p, fp), lambda l: (0, 0)),             # h_init    (resident)
            pl.BlockSpec((1, fp, fp), lambda l: (l, 0, 0)),              # wb_basis  (per layer)
            pl.BlockSpec((1, NU_MAX * fp, fp), lambda l: (l, 0, 0)),     # wb_ws     (per layer)
            pl.BlockSpec((1, 1, fp), lambda l: (l, 0, 0)),               # cw_vec    (per layer)
            pl.BlockSpec((1, 1, fp), lambda l: (l, 0, 0)),               # mw_vec    (per layer)
            pl.BlockSpec((fp, OUT_PAD), lambda l: (0, 0)),               # pred_w    (resident)
            pl.BlockSpec((1, OUT_PAD), lambda l: (0, 0)),                # pred_b    (resident)
        ],
        out_specs=pl.BlockSpec((1, OUT_PAD), lambda l: (0, 0)),
        scratch_shapes=[pltpu.VMEM((n_nodes_p, fp), jnp.float32)],       # resident node features
    )
    # TODO(synk): for larger graphs add a node-block grid axis ("parallel", v7x
    # megacore) and 256-multiple tiles; not useful at 8 nodes / 16 edges.
    return pl.pallas_call(
        kernel,
        out_shape=jax.ShapeDtypeStruct((1, OUT_PAD), jnp.float32),
        grid_spec=grid_spec,
        compiler_params=pltpu.CompilerParams(
            dimension_semantics=("arbitrary",)),    # layers are sequential (h carried in VMEM)
    )(edge_attr, S, R, h_init,
      layer_params["wb_basis"], layer_params["wb_ws"],
      layer_params["cw"], layer_params["mw"], pred_w, pred_b)


def _round_up(x, m):
    return ((x + m - 1) // m) * m


@jax.jit
def cartesian_mace_forward(pos, edge_index, atoms, batch, params):
    senders, receivers = edge_index[0], edge_index[1]
    n_edges = senders.shape[0]
    n_nodes = pos.shape[0]
    n_edges_p = _round_up(n_edges, 8)
    n_nodes_p = _round_up(n_nodes, 8)

    rel_pos = pos[senders] - pos[receivers]
    dists = jnp.linalg.norm(rel_pos, axis=-1)
    norm_rel_pos = rel_pos / dists[:, None]     # NB: no self-loop/eps guard, as in the reference

    # tensor_prod(r, order) for order 0..self_tp_rank_max, flattened & concatenated
    r0 = jnp.ones((n_edges, 1), jnp.float32)
    r1 = norm_rel_pos
    r2 = (norm_rel_pos[:, :, None] * norm_rel_pos[:, None, :]).reshape(n_edges, DIM * DIM)
    rcat = jnp.concatenate([r0, r1, r2], axis=1)                         # (E, L)

    # e_rbf.  NB: the reference code does .reshape (not transpose) on the
    # (n_channels, n_edges) result; reproduced verbatim.
    n_vals = jnp.arange(1, N_CHANNELS + 1, dtype=jnp.float32)[:, None]
    raw = (jnp.sqrt(2.0 / R_CUT)
           * jnp.sin(n_vals * jnp.pi * dists[None, :] / R_CUT) / dists[None, :])
    radial = raw.reshape(n_edges, N_CHANNELS)

    # edge_attr[e, comp*NC+ch] = radial[e, ch] * r_tensor[e, comp] is layer
    # invariant: compute once here (hoisted out of the kernel), pad to (Ep, FP).
    edge_attr = (rcat[:, :, None] * radial[:, None, :]).reshape(n_edges, F)
    edge_attr = jnp.zeros((n_edges_p, FP), jnp.float32).at[:n_edges, :F].set(edge_attr)

    # Dense one-hot scatter/gather matrices in bf16 (MXU-native); padded
    # rows/columns are zero so fake edges/nodes contribute nothing.
    # TODO(synk): at realistic graph sizes replace with scalar-prefetch index
    # gather + receiver-sorted segment-sum (O(E*N) VMEM does not scale).
    S = jnp.zeros((n_edges_p, n_nodes_p), jnp.bfloat16).at[:n_edges].set(
        jax.nn.one_hot(senders, n_nodes_p, dtype=jnp.bfloat16))
    R = jnp.zeros((n_nodes_p, n_edges_p), jnp.bfloat16).at[:, :n_edges].set(
        jax.nn.one_hot(receivers, n_nodes_p, dtype=jnp.bfloat16).T)

    # h[0] = Embedding(1, n_channels)(atoms); higher ranks start at zero.
    h0 = params["emb"][atoms]                                            # (N, NC)
    h_init = jnp.zeros((n_nodes_p, FP), jnp.float32).at[:n_nodes, :N_CHANNELS].set(h0)

    out = _fused_mace_call(edge_attr, S, R, h_init, params["layers"],
                           params["pred_w"], params["pred_b"])
    return out[:, :OUT_DIM]


# ------------------------------ parameter init --------------------------------
def _init_orthogonal(key, extra_dim):
    """init_orthogonal_weights(n_channels, extra_dim) -> (extra_dim, NC, NC)."""
    mats = []
    for k in jax.random.split(key, extra_dim):
        q, _ = jnp.linalg.qr(jax.random.normal(k, (N_CHANNELS, N_CHANNELS), jnp.float32))
        mats.append(q)
    return np.asarray(jnp.stack(mats))


def _rank_block_diag(w_ranks):
    """Per-rank (NC,NC) channel-mix weights -> lane-padded (FP,FP) block-diagonal."""
    w = np.asarray(w_ranks, np.float32)
    out = np.zeros((FP, FP), np.float32)
    for comp in range(L):
        c = int(RANK_OF_COMP[comp])
        s = comp * N_CHANNELS
        out[s:s + N_CHANNELS, s:s + N_CHANNELS] = w[c].T
    return out


def _rank_colsum_vec(w_ranks):
    """Exactly reproduces einsum('ij,kj...->kj...', W_c, x): per-channel column sums."""
    w = np.asarray(w_ranks, np.float32)
    out = np.zeros((1, FP), np.float32)
    for comp in range(L):
        c = int(RANK_OF_COMP[comp])
        s = comp * N_CHANNELS
        out[0, s:s + N_CHANNELS] = w[c].sum(axis=0)
    return out


def _pack_pred_weights(key):
    """Linear(tot_length, out_dim) with linearise_features folded into a row
    permutation of the weight matrix, lane-padded to (FP, OUT_PAD)."""
    tot_length = F                                                       # n_ch*(1+3+9), scalar_pred=False
    w_lin = np.asarray(jax.random.normal(key, (tot_length, OUT_DIM), jnp.float32)
                       / np.sqrt(float(tot_length)))
    w = np.zeros((FP, OUT_PAD), np.float32)
    base = 0
    for c in range(RANK_MAX + 1):
        lc = COMP_LEN[c]
        off = int(OFFSETS[c])
        for ch in range(N_CHANNELS):
            for k in range(lc):
                # our column (comp-major, channel fastest) <- linearised row (channel-major)
                w[(off + k) * N_CHANNELS + ch, :OUT_DIM] = w_lin[base + ch * lc + k]
        base += N_CHANNELS * lc
    b = np.zeros((1, OUT_PAD), np.float32)
    return jnp.asarray(w, jnp.bfloat16), jnp.asarray(b, jnp.float32)


def init_params(key):
    k_emb, k_layers, k_pred = jax.random.split(key, 3)
    emb = jax.random.normal(k_emb, (1, N_CHANNELS), jnp.float32)         # Embedding(1, n_channels)

    wb_basis, wb_ws, cw, mw = [], [], [], []
    for i in range(NUM_LAYERS):
        k = jax.random.fold_in(k_layers, i)
        k1, k2, k3, k4 = jax.random.split(k, 4)
        ab_w = _init_orthogonal(k1, BASIS_RANK_MAX + 1)                  # AtomicBasis channel mix (reconstructed)
        ws_w = [_init_orthogonal(jax.random.fold_in(k2, nu), FEATURE_RANK_MAX + 1)
                for nu in range(NU_MAX)]                                 # WeightedSum weights (reconstructed)
        cw_w = _init_orthogonal(k3, FEATURE_RANK_MAX + 1)                # channel_weights
        mw_w = _init_orthogonal(k4, FEATURE_RANK_MAX + 1)                # message_weights
        wb_basis.append(_rank_block_diag(ab_w))
        wb_ws.append(np.concatenate([_rank_block_diag(w) for w in ws_w], axis=0))
        cw.append(_rank_colsum_vec(cw_w))
        mw.append(_rank_colsum_vec(mw_w))

    layers = dict(
        wb_basis=jnp.asarray(np.stack(wb_basis), jnp.bfloat16),          # (NL, FP, FP)
        wb_ws=jnp.asarray(np.stack(wb_ws), jnp.bfloat16),                # (NL, NU_MAX*FP, FP)
        cw=jnp.asarray(np.stack(cw), jnp.float32),                       # (NL, 1, FP)
        mw=jnp.asarray(np.stack(mw), jnp.float32),                       # (NL, 1, FP)
    )
    pred_w, pred_b = _pack_pred_weights(k_pred)
    return dict(emb=emb, layers=layers, pred_w=pred_w, pred_b=pred_b)


# ---------------------------------- main --------------------------------------
if __name__ == "__main__":
    key = jax.random.PRNGKey(0)
    k_pos, k_par = jax.random.split(key)

    n_nodes = 8
    pos = jax.random.normal(k_pos, (n_nodes, DIM), jnp.float32)
    # single neighbourhood: bidirectional star around node 0 -> 14 edges
    src = np.concatenate([np.arange(1, n_nodes), np.zeros(n_nodes - 1, np.int64)]).astype(np.int32)
    dst = np.concatenate([np.zeros(n_nodes - 1, np.int64), np.arange(1, n_nodes)]).astype(np.int32)
    edge_index = jnp.asarray(np.stack([src, dst]))                       # (2, 14)
    atoms = jnp.zeros((n_nodes,), jnp.int32)
    batch = jnp.zeros((n_nodes,), jnp.int32)

    params = init_params(k_par)
    out = cartesian_mace_forward(pos, edge_index, atoms, batch, params)
    out = jax.block_until_ready(out)
    assert out.shape == (1, OUT_DIM) and out.dtype == jnp.float32
    print("KERNEL_OK")
</pallas_src>

<mosaic_0001>
module attributes {stable_mosaic.version = 11 : i64} {
  func.func @fused_mace_kernel(%arg0: i32, %arg1: memref<16x128xf32, #tpu.memory_space<vmem>>, %arg2: memref<16x8xbf16, #tpu.memory_space<vmem>>, %arg3: memref<8x16xbf16, #tpu.memory_space<vmem>>, %arg4: memref<8x128xf32, #tpu.memory_space<vmem>>, %arg5: memref<1x128x128xbf16, #tpu.memory_space<vmem>>, %arg6: memref<1x256x128xbf16, #tpu.memory_space<vmem>>, %arg7: memref<1x1x128xf32, #tpu.memory_space<vmem>>, %arg8: memref<1x1x128xf32, #tpu.memory_space<vmem>>, %arg9: memref<128x128xbf16, #tpu.memory_space<vmem>>, %arg10: memref<1x128xf32, #tpu.memory_space<vmem>>, %arg11: memref<1x128xf32, #tpu.memory_space<vmem>>, %arg12: memref<8x128xf32, #tpu.memory_space<vmem>>) attributes {dimension_semantics = [#tpu.dimension_semantics<arbitrary>], iteration_bounds = array<i64: 2>, scalar_prefetch = 0 : i64, scratch_operands = 1 : i64, tpu.core_type = #tpu.core_type<tc>, window_params = [{pipeline_mode = #tpu.pipeline_mode<synchronous>, transform_indices = @transform_0, window_bounds = array<i64: 16, 128>}, {pipeline_mode = #tpu.pipeline_mode<synchronous>, transform_indices = @transform_1, window_bounds = array<i64: 16, 8>}, {pipeline_mode = #tpu.pipeline_mode<synchronous>, transform_indices = @transform_2, window_bounds = array<i64: 8, 16>}, {pipeline_mode = #tpu.pipeline_mode<synchronous>, transform_indices = @transform_3, window_bounds = array<i64: 8, 128>}, {transform_indices = @transform_4, window_bounds = array<i64: 1, 128, 128>}, {transform_indices = @transform_5, window_bounds = array<i64: 1, 256, 128>}, {transform_indices = @transform_6, window_bounds = array<i64: 1, 1, 128>}, {transform_indices = @transform_7, window_bounds = array<i64: 1, 1, 128>}, {pipeline_mode = #tpu.pipeline_mode<synchronous>, transform_indices = @transform_8, window_bounds = array<i64: 128, 128>}, {pipeline_mode = #tpu.pipeline_mode<synchronous>, transform_indices = @transform_9, window_bounds = array<i64: 1, 128>}, {pipeline_mode = #tpu.pipeline_mode<synchronous>, transform_indices = @transform_10, window_bounds = array<i64: 1, 128>}]} {
    %c0_i32 = arith.constant 0 : i32
    %0 = arith.cmpi eq, %arg0, %c0_i32 : i32
    %1 = arith.extui %0 : i1 to i32
    %c0_i32_0 = arith.constant 0 : i32
    %2 = arith.cmpi ne, %1, %c0_i32_0 : i32
    scf.if %2 {
      %c0_39 = arith.constant 0 : index
      %c0_40 = arith.constant 0 : index
      %111 = vector.load %arg4[%c0_39, %c0_40] : memref<8x128xf32, #tpu.memory_space<vmem>>, vector<8x128xf32>
      %c0_41 = arith.constant 0 : index
      %c0_42 = arith.constant 0 : index
      %112 = vector.load %arg12[%c0_41, %c0_42] : memref<8x128xf32, #tpu.memory_space<vmem>>, vector<8x128xf32>
      tpu.vector_store %arg12[%c0_41, %c0_42], %111 {strides = array<i32>} : memref<8x128xf32, #tpu.memory_space<vmem>>, vector<8x128xf32>,
    } else {
    }
    %c0 = arith.constant 0 : index
    %c0_1 = arith.constant 0 : index
    %3 = vector.load %arg12[%c0, %c0_1] : memref<8x128xf32, #tpu.memory_space<vmem>>, vector<8x128xf32>
    %c0_2 = arith.constant 0 : index
    %c0_3 = arith.constant 0 : index
    %4 = vector.load %arg2[%c0_2, %c0_3] : memref<16x8xbf16, #tpu.memory_space<vmem>>, vector<16x8xbf16>
    %c0_4 = arith.constant 0 : index
    %c0_5 = arith.constant 0 : index
    %5 = vector.load %arg3[%c0_4, %c0_5] : memref<8x16xbf16, #tpu.memory_space<vmem>>, vector<8x16xbf16>
    %c0_6 = arith.constant 0 : index
    %c0_7 = arith.constant 0 : index
    %6 = vector.load %arg1[%c0_6, %c0_7] : memref<16x128xf32, #tpu.memory_space<vmem>>, vector<16x128xf32>
    %7 = tpu.iota {dimensions = array<i32: 1>} : vector<1x128xi32>
    %c4_i32 = arith.constant 4 : i32
    %c0_i32_8 = arith.constant 0 : i32
    %8 = arith.cmpi eq, %c4_i32, %c0_i32_8 : i32
    %c1_i32 = arith.constant 1 : i32
    %9 = arith.select %8, %c1_i32, %c4_i32 : i32
    %10 = vector.broadcast %9 : i32 to vector<1x128xi32>
    %11 = arith.remsi %7, %10 : vector<1x128xi32>
    %c0_i32_9 = arith.constant 0 : i32
    %12 = vector.broadcast %c0_i32_9 : i32 to vector<1x128xi32>
    %13 = arith.cmpi ne, %11, %12 : vector<1x128xi32>
    %c0_i32_10 = arith.constant 0 : i32
    %14 = vector.broadcast %c0_i32_10 : i32 to vector<1x128xi32>
    %15 = arith.cmpi slt, %11, %14 : vector<1x128xi32>
    %c0_i32_11 = arith.constant 0 : i32
    %16 = arith.cmpi slt, %9, %c0_i32_11 : i32
    %17 = vector.broadcast %16 : i1 to vector<1x128xi1>
    %18 = vector.broadcast %17 : vector<1x128xi1> to vector<1x128xi1>
    %19 = arith.xori %15, %18 : vector<1x128xi1>
    %20 = arith.andi %19, %13 : vector<1x128xi1>
    %21 = vector.broadcast %9 : i32 to vector<1x128xi32>
    %22 = arith.addi %11, %21 : vector<1x128xi32>
    %23 = arith.select %20, %22, %11 : vector<1x128xi1>, vector<1x128xi32>
    %24 = vector.extract_strided_slice %3 {offsets = [0, 3], sizes = [8, 1], strides = [1, 1]} : vector<8x128xf32> to vector<8x1xf32>
    %c2_i32 = arith.constant 2 : i32
    %25 = vector.broadcast %c2_i32 : i32 to vector<1x128xi32>
    %26 = arith.cmpi eq, %23, %25 : vector<1x128xi32>
    %27 = vector.extract_strided_slice %3 {offsets = [0, 2], sizes = [8, 1], strides = [1, 1]} : vector<8x128xf32> to vector<8x1xf32>
    %28 = vector.shape_cast %26 : vector<1x128xi1> to vector<1x128xi1>
    %29 = vector.broadcast %28 : vector<1x128xi1> to vector<8x128xi1>
    %30 = vector.shape_cast %27 : vector<8x1xf32> to vector<8x1xf32>
    %31 = vector.broadcast %30 : vector<8x1xf32> to vector<8x128xf32>
    %32 = vector.shape_cast %24 : vector<8x1xf32> to vector<8x1xf32>
    %33 = vector.broadcast %32 : vector<8x1xf32> to vector<8x128xf32>
    %34 = arith.select %29, %31, %33 : vector<8x128xi1>, vector<8x128xf32>
    %c1_i32_12 = arith.constant 1 : i32
    %35 = vector.broadcast %c1_i32_12 : i32 to vector<1x128xi32>
    %36 = arith.cmpi eq, %23, %35 : vector<1x128xi32>
    %37 = vector.extract_strided_slice %3 {offsets = [0, 1], sizes = [8, 1], strides = [1, 1]} : vector<8x128xf32> to vector<8x1xf32>
    %38 = vector.shape_cast %36 : vector<1x128xi1> to vector<1x128xi1>
    %39 = vector.broadcast %38 : vector<1x128xi1> to vector<8x128xi1>
    %40 = vector.shape_cast %37 : vector<8x1xf32> to vector<8x1xf32>
    %41 = vector.broadcast %40 : vector<8x1xf32> to vector<8x128xf32>
    %42 = arith.select %39, %41, %34 : vector<8x128xi1>, vector<8x128xf32>
    %c0_i32_13 = arith.constant 0 : i32
    %43 = vector.broadcast %c0_i32_13 : i32 to vector<1x128xi32>
    %44 = arith.cmpi eq, %23, %43 : vector<1x128xi32>
    %45 = vector.extract_strided_slice %3 {offsets = [0, 0], sizes = [8, 1], strides = [1, 1]} : vector<8x128xf32> to vector<8x1xf32>
    %46 = vector.shape_cast %44 : vector<1x128xi1> to vector<1x128xi1>
    %47 = vector.broadcast %46 : vector<1x128xi1> to vector<8x128xi1>
    %48 = vector.shape_cast %45 : vector<8x1xf32> to vector<8x1xf32>
    %49 = vector.broadcast %48 : vector<8x1xf32> to vector<8x128xf32>
    %50 = arith.select %47, %49, %42 : vector<8x128xi1>, vector<8x128xf32>
    %51 = arith.truncf %50 : vector<8x128xf32> to vector<8x128xbf16>
    %cst = arith.constant dense<0.000000e+00> : vector<16x128xf32>
    %52 = tpu.matmul %4, %51, %cst {dimension_numbers = #tpu.dot_dimension_numbers<[1], [0], [0], [1], [0, 0, 1, 1], [], []>} : vector<16x8xbf16>, vector<8x128xbf16>, vector<16x128xf32> -> vector<16x128xf32>
    %53 = arith.mulf %6, %52 : vector<16x128xf32>
    %54 = arith.truncf %53 : vector<16x128xf32> to vector<16x128xbf16>
    %cst_14 = arith.constant dense<0.000000e+00> : vector<8x128xf32>
    %55 = tpu.matmul %5, %54, %cst_14 {dimension_numbers = #tpu.dot_dimension_numbers<[1], [0], [0], [1], [0, 0, 1, 1], [], []>} : vector<8x16xbf16>, vector<16x128xbf16>, vector<8x128xf32> -> vector<8x128xf32>
    %56 = arith.truncf %55 : vector<8x128xf32> to vector<8x128xbf16>
    %c0_15 = arith.constant 0 : index
    %c0_16 = arith.constant 0 : index
    %c0_17 = arith.constant 0 : index
    %57 = vector.load %arg5[%c0_15, %c0_16, %c0_17] : memref<1x128x128xbf16, #tpu.memory_space<vmem>>, vector<1x128x128xbf16>
    %58 = vector.shape_cast %57 : vector<1x128x128xbf16> to vector<128x128xbf16>
    %cst_18 = arith.constant dense<0.000000e+00> : vector<8x128xf32>
    %59 = tpu.matmul %56, %58, %cst_18 {dimension_numbers = #tpu.dot_dimension_numbers<[1], [0], [0], [1], [0, 0, 1, 1], [], []>} : vector<8x128xbf16>, vector<128x128xbf16>, vector<8x128xf32> -> vector<8x128xf32>
    %60 = arith.truncf %59 : vector<8x128xf32> to vector<8x128xbf16>
    %c0_19 = arith.constant 0 : index
    %c0_20 = arith.constant 0 : index
    %c0_21 = arith.constant 0 : index
    %61 = vector.load %arg6[%c0_19, %c0_20, %c0_21] : memref<1x256x128xbf16, #tpu.memory_space<vmem>>, vector<1x128x128xbf16>
    %62 = vector.shape_cast %61 : vector<1x128x128xbf16> to vector<128x128xbf16>
    %cst_22 = arith.constant dense<0.000000e+00> : vector<8x128xf32>
    %63 = tpu.matmul %60, %62, %cst_22 {dimension_numbers = #tpu.dot_dimension_numbers<[1], [0], [0], [1], [0, 0, 1, 1], [], []>} : vector<8x128xbf16>, vector<128x128xbf16>, vector<8x128xf32> -> vector<8x128xf32>
    %64 = vector.extract_strided_slice %59 {offsets = [0, 0], sizes = [8, 4], strides = [1, 1]} : vector<8x128xf32> to vector<8x4xf32>
    %65 = vector.extract_strided_slice %64 {offsets = [0, 3], sizes = [8, 1], strides = [1, 1]} : vector<8x4xf32> to vector<8x1xf32>
    %c2_i32_23 = arith.constant 2 : i32
    %66 = vector.broadcast %c2_i32_23 : i32 to vector<1x128xi32>
    %67 = arith.cmpi eq, %23, %66 : vector<1x128xi32>
    %68 = vector.extract_strided_slice %64 {offsets = [0, 2], sizes = [8, 1], strides = [1, 1]} : vector<8x4xf32> to vector<8x1xf32>
    %69 = vector.shape_cast %67 : vector<1x128xi1> to vector<1x128xi1>
    %70 = vector.broadcast %69 : vector<1x128xi1> to vector<8x128xi1>
    %71 = vector.shape_cast %68 : vector<8x1xf32> to vector<8x1xf32>
    %72 = vector.broadcast %71 : vector<8x1xf32> to vector<8x128xf32>
    %73 = vector.shape_cast %65 : vector<8x1xf32> to vector<8x1xf32>
    %74 = vector.broadcast %73 : vector<8x1xf32> to vector<8x128xf32>
    %75 = arith.select %70, %72, %74 : vector<8x128xi1>, vector<8x128xf32>
    %c1_i32_24 = arith.constant 1 : i32
    %76 = vector.broadcast %c1_i32_24 : i32 to vector<1x128xi32>
    %77 = arith.cmpi eq, %23, %76 : vector<1x128xi32>
    %78 = vector.extract_strided_slice %64 {offsets = [0, 1], sizes = [8, 1], strides = [1, 1]} : vector<8x4xf32> to vector<8x1xf32>
    %79 = vector.shape_cast %77 : vector<1x128xi1> to vector<1x128xi1>
    %80 = vector.broadcast %79 : vector<1x128xi1> to vector<8x128xi1>
    %81 = vector.shape_cast %78 : vector<8x1xf32> to vector<8x1xf32>
    %82 = vector.broadcast %81 : vector<8x1xf32> to vector<8x128xf32>
    %83 = arith.select %80, %82, %75 : vector<8x128xi1>, vector<8x128xf32>
    %c0_i32_25 = arith.constant 0 : i32
    %84 = vector.broadcast %c0_i32_25 : i32 to vector<1x128xi32>
    %85 = arith.cmpi eq, %23, %84 : vector<1x128xi32>
    %86 = vector.extract_strided_slice %64 {offsets = [0, 0], sizes = [8, 1], strides = [1, 1]} : vector<8x4xf32> to vector<8x1xf32>
    %87 = vector.shape_cast %85 : vector<1x128xi1> to vector<1x128xi1>
    %88 = vector.broadcast %87 : vector<1x128xi1> to vector<8x128xi1>
    %89 = vector.shape_cast %86 : vector<8x1xf32> to vector<8x1xf32>
    %90 = vector.broadcast %89 : vector<8x1xf32> to vector<8x128xf32>
    %91 = arith.select %88, %90, %83 : vector<8x128xi1>, vector<8x128xf32>
    %92 = arith.mulf %59, %91 : vector<8x128xf32>
    %93 = arith.truncf %92 : vector<8x128xf32> to vector<8x128xbf16>
    %c0_26 = arith.constant 0 : index
    %c128 = arith.constant 128 : index
    %c0_27 = arith.constant 0 : index
    %94 = vector.load %arg6[%c0_26, %c128, %c0_27] : memref<1x256x128xbf16, #tpu.memory_space<vmem>>, vector<1x128x128xbf16>
    %95 = vector.shape_cast %94 : vector<1x128x128xbf16> to vector<128x128xbf16>
    %cst_28 = arith.constant dense<0.000000e+00> : vector<8x128xf32>
    %96 = tpu.matmul %93, %95, %cst_28 {dimension_numbers = #tpu.dot_dimension_numbers<[1], [0], [0], [1], [0, 0, 1, 1], [], []>} : vector<8x128xbf16>, vector<128x128xbf16>, vector<8x128xf32> -> vector<8x128xf32>
    %97 = arith.addf %63, %96 : vector<8x128xf32>
    %c0_29 = arith.constant 0 : index
    %c0_30 = arith.constant 0 : index
    %c0_31 = arith.constant 0 : index
    %98 = vector.load %arg7[%c0_29, %c0_30, %c0_31] : memref<1x1x128xf32, #tpu.memory_space<vmem>>, vector<1x1x128xf32>
    %99 = vector.shape_cast %98 : vector<1x1x128xf32> to vector<1x128xf32>
    %100 = vector.broadcast %99 : vector<1x128xf32> to vector<8x128xf32>
    %101 = arith.mulf %100, %3 : vector<8x128xf32>
    %c0_32 = arith.constant 0 : index
    %c0_33 = arith.constant 0 : index
    %c0_34 = arith.constant 0 : index
    %102 = vector.load %arg8[%c0_32, %c0_33, %c0_34] : memref<1x1x128xf32, #tpu.memory_space<vmem>>, vector<1x1x128xf32>
    %103 = vector.shape_cast %102 : vector<1x1x128xf32> to vector<1x128xf32>
    %104 = vector.broadcast %103 : vector<1x128xf32> to vector<8x128xf32>
    %105 = arith.mulf %104, %97 : vector<8x128xf32>
    %106 = arith.addf %101, %105 : vector<8x128xf32>
    %c0_35 = arith.constant 0 : index
    %c0_36 = arith.constant 0 : index
    %107 = vector.load %arg12[%c0_35, %c0_36] : memref<8x128xf32, #tpu.memory_space<vmem>>, vector<8x128xf32>
    tpu.vector_store %arg12[%c0_35, %c0_36], %106 {strides = array<i32>} : memref<8x128xf32, #tpu.memory_space<vmem>>, vector<8x128xf32>,
    %c1_i32_37 = arith.constant 1 : i32
    %108 = arith.cmpi eq, %arg0, %c1_i32_37 : i32
    %109 = arith.extui %108 : i1 to i32
    %c0_i32_38 = arith.constant 0 : i32
    %110 = arith.cmpi ne, %109, %c0_i32_38 : i32
    scf.if %110 {
      %cst_39 = arith.constant dense<0.000000e+00> : vector<128xf32>
      %111 = vector.multi_reduction <add>, %106, %cst_39 [0] : vector<8x128xf32> to vector<128xf32>
      %112 = vector.shape_cast %111 : vector<128xf32> to vector<1x128xf32>
      %113 = arith.truncf %112 : vector<1x128xf32> to vector<1x128xbf16>
      %c0_40 = arith.constant 0 : index
      %c0_41 = arith.constant 0 : index
      %114 = vector.load %arg9[%c0_40, %c0_41] : memref<128x128xbf16, #tpu.memory_space<vmem>>, vector<128x128xbf16>
      %cst_42 = arith.constant dense<0.000000e+00> : vector<1x128xf32>
      %115 = tpu.matmul %113, %114, %cst_42 {dimension_numbers = #tpu.dot_dimension_numbers<[1], [0], [0], [1], [0, 0, 1, 1], [], []>} : vector<1x128xbf16>, vector<128x128xbf16>, vector<1x128xf32> -> vector<1x128xf32>
      %c0_43 = arith.constant 0 : index
      %c0_44 = arith.constant 0 : index
      %116 = vector.load %arg10[%c0_43, %c0_44] : memref<1x128xf32, #tpu.memory_space<vmem>>, vector<1x128xf32>
      %117 = arith.addf %115, %116 : vector<1x128xf32>
      %c0_45 = arith.constant 0 : index
      %c0_46 = arith.constant 0 : index
      %118 = vector.load %arg11[%c0_45, %c0_46] : memref<1x128xf32, #tpu.memory_space<vmem>>, vector<1x128xf32>
      tpu.vector_store %arg11[%c0_45, %c0_46], %117 {strides = array<i32>} : memref<1x128xf32, #tpu.memory_space<vmem>>, vector<1x128xf32>,
    } else {
    }
    return
  }
  func.func @transform_0(%arg0: i32) -> (i32, i32) {
    %c0_i32 = arith.constant 0 : i32
    %c0_i32_0 = arith.constant 0 : i32
    %c0_i32_1 = arith.constant 0 : i32
    return %c0_i32, %c0_i32_0 : i32, i32
  }
  func.func @transform_1(%arg0: i32) -> (i32, i32) {
    %c0_i32 = arith.constant 0 : i32
    %c0_i32_0 = arith.constant 0 : i32
    %c0_i32_1 = arith.constant 0 : i32
    return %c0_i32, %c0_i32_0 : i32, i32
  }
  func.func @transform_2(%arg0: i32) -> (i32, i32) {
    %c0_i32 = arith.constant 0 : i32
    %c0_i32_0 = arith.constant 0 : i32
    %c0_i32_1 = arith.constant 0 : i32
    return %c0_i32, %c0_i32_0 : i32, i32
  }
  func.func @transform_3(%arg0: i32) -> (i32, i32) {
    %c0_i32 = arith.constant 0 : i32
    %c0_i32_0 = arith.constant 0 : i32
    %c0_i32_1 = arith.constant 0 : i32
    return %c0_i32, %c0_i32_0 : i32, i32
  }
  func.func @transform_4(%arg0: i32) -> (i32, i32, i32) {
    %c0_i32 = arith.constant 0 : i32
    %c0_i32_0 = arith.constant 0 : i32
    %c0_i32_1 = arith.constant 0 : i32
    return %arg0, %c0_i32, %c0_i32_0 : i32, i32, i32
  }
  func.func @transform_5(%arg0: i32) -> (i32, i32, i32) {
    %c0_i32 = arith.constant 0 : i32
    %c0_i32_0 = arith.constant 0 : i32
    %c0_i32_1 = arith.constant 0 : i32
    return %arg0, %c0_i32, %c0_i32_0 : i32, i32, i32
  }
  func.func @transform_6(%arg0: i32) -> (i32, i32, i32) {
    %c0_i32 = arith.constant 0 : i32
    %c0_i32_0 = arith.constant 0 : i32
    %c0_i32_1 = arith.constant 0 : i32
    return %arg0, %c0_i32, %c0_i32_0 : i32, i32, i32
  }
  func.func @transform_7(%arg0: i32) -> (i32, i32, i32) {
    %c0_i32 = arith.constant 0 : i32
    %c0_i32_0 = arith.constant 0 : i32
    %c0_i32_1 = arith.constant 0 : i32
    return %arg0, %c0_i32, %c0_i32_0 : i32, i32, i32
  }
  func.func @transform_8(%arg0: i32) -> (i32, i32) {
    %c0_i32 = arith.constant 0 : i32
    %c0_i32_0 = arith.constant 0 : i32
    %c0_i32_1 = arith.constant 0 : i32
    return %c0_i32, %c0_i32_0 : i32, i32
  }
  func.func @transform_9(%arg0: i32) -> (i32, i32) {
    %c0_i32 = arith.constant 0 : i32
    %c0_i32_0 = arith.constant 0 : i32
    %c0_i32_1 = arith.constant 0 : i32
    return %c0_i32, %c0_i32_0 : i32, i32
  }
  func.func @transform_10(%arg0: i32) -> (i32, i32) {
    %c0_i32 = arith.constant 0 : i32
    %c0_i32_0 = arith.constant 0 : i32
    %c0_i32_1 = arith.constant 0 : i32
    return %c0_i32, %c0_i32_0 : i32, i32
  }
}

</mosaic_0001>

<bundles_post_ra>
// kernel: cartesian_mace_forward.1
= control target key start
LH: loop header
LB: loop body
LE: loop exit
PB: predicated region body
PF: predicated region fallthrough
CT: control target
= control target key end

     0   :  { %15 = vsyncpa [#allocation4], 0  ;;  %s1453_s13 = smov 0   ;;  %s1655_s0 = inlined_call_operand.vmem [shape: f32[16,128], index: 0, kind: input, shape index: {}]   ;;  %s1656_s1 = inlined_call_operand.vmem [shape: bf16[16,8], index: 1, kind: input, shape index: {}]   ;;  %s1657_s2 = inlined_call_operand.vmem [shape: bf16[8,16], index: 2, kind: input, shape index: {}]   ;;  %s1658_s3 = inlined_call_operand.vmem [shape: f32[8,128], index: 3, kind: input, shape index: {}]   ;;  %s1659_s4 = inlined_call_operand.vmem [shape: bf16[2,128,128], index: 4, kind: input, shape index: {}]   ;;  %s1660_s5 = inlined_call_operand.vmem [shape: bf16[2,256,128], index: 5, kind: input, shape index: {}]   ;;  %s1661_s6 = inlined_call_operand.vmem [shape: f32[2,1,128], index: 6, kind: input, shape index: {}]   ;;  %s1662_s7 = inlined_call_operand.vmem [shape: f32[2,1,128], index: 7, kind: input, shape index: {}]   ;;  %s1663_s8 = inlined_call_operand.vmem [shape: bf16[128,128], index: 8, kind: input, shape index: {}]   ;;  %s1664_s9 = inlined_call_operand.vmem [shape: f32[1,128], index: 9, kind: input, shape index: {}]   ;;  %s1665_s10 = inlined_call_operand.hbm [shape: f32[1,128], index: 10, kind: output, shape index: {}]  }
   0x1 LB: > { %s1459_s14 = sadd.s32 4294967295, %s1387_s13   ;;  %p1102_p0 = scmp.ge.s32.totalorder %s1387_s13, 1  ;;  %s1387_s13 = sphi %s1453_s13, %s21_s13  }
   0x2   : > { %p334_p1 = scmp.lt.s32.totalorder %s1387_s13, 3 }
   0x4   : > { %p335_p2 = pnand %p1102_p0, %p334_p1 }
   0x5   : > { %p378_p3 = scmp.lt.s32.totalorder (!%p335_p2), %s1459_s14, 1  ;;  %p1107_p4 = scmp.ne.s32.totalorder (!%p335_p2), %s1459_s14, 0 }
   0x6   : > { %338 = sbr.rel (%p335_p2) target bundleno = 1453 (0x5ad), region = 60 }
   0xd   : > { %s1465_s15 = scalar_select %p378_p3, %s1459_s14, 1 }
   0xe   : > { %398 = sbr.rel (%p1107_p4) target bundleno = 21 (0x15), region = 64  ;;  %v399_v0 = vld [vmem:[%s1658_s3] sm:$0xff] (!%p1107_p4) }
   0xf   : > { %s1150_s16 = sshll.u32 %s1465_s15, 6  ;;  %s1151_s17 = sshll.u32 %s1465_s15, 7  ;;  %400 = vst [vmem:[#allocation2] sm:$0xff] (!%p1107_p4), %v399_v0 }
  0x10   : > { %s1472_s20 = scalar_lea.vmem %s1659_s4, %s1150_s16  ;;  %s1477_s23 = scalar_lea.vmem %s1660_s5, %s1151_s17 }
  0x11   : > { %s390_s26 = scalar_lea.vmem %s1661_s6, %s1465_s15  ;;  %s393_s29 = scalar_lea.vmem %s1662_s7, %s1465_s15 }
  0x15 PF: > { %v1389_v2 = vmov 2   ;;  %v1390_v3 = vmov 1   ;;  %v1391_v4 = vmov 3   ;;  %v1392_v5 = vmov 0   ;;  %v1318_v19 = vld [vmem:[%s1656_s1] sm:$0xff]   ;;  %v406_v22 = vld [vmem:[%s1655_s0 + $0x8] sm:$0xff] }
  0x16   : > { %v1491_v1 = vld [vmem:[#allocation2] sm:$0xff]  ;;  %1311 = vset.pattern.permute.xlu0 %v1389_v2  ;;  %1313 = vset.pattern.permute.xlu1 %v1390_v3  ;;  %v1393_v6 = vmov 0.0   ;;  %vm1394_vm0 = vmmov 0   ;;  %v407_v7 = vlaneseq  ;;  %vm460_vm4 = vcmask 1043456   ;;  %v1320_v31 = vld [vmem:[%s1472_s20 + $0x8] sm:$0xff]   ;;  %v1321_v32 = vld [vmem:[%s1472_s20 + $0x10] sm:$0xff]  }
  0x17   : > { %426 = vperm.xlu0 %1311, %v1491_v1   ;;  %438 = vperm.xlu1 %1313, %v1491_v1   ;;  %vm456_vm5 = vcmask 64512   ;;  %v405_v20 = vld [vmem:[%s1655_s0] sm:$0xff]  ;;  %vm508_vm6 = vcmask 130048   ;;  %v1322_v33 = vld [vmem:[%s1472_s20 + $0x18] sm:$0xff]   ;;  %v1324_v35 = vld [vmem:[%s1472_s20 + $0x28] sm:$0xff]   ;;  %p1137_p5 = scmp.ne.s32.totalorder %s1459_s14, 1 }
  0x18   : > { %1192 = vmatprep.subr.bf16.mxu0 %v1393_v6  ;;  %1224 = vmatprep.subr.bf16.mxu1 %v1393_v6  ;;  %v408_v8 = vand.u32 127, %v407_v7  ;;  %v404_v29 = vld [vmem:[%s1657_s2] sm:$0xf]  ;;  %v1325_v36 = vld [vmem:[%s1472_s20 + $0x30] sm:$0xff]   ;;  %v1326_v37 = vld [vmem:[%s1472_s20 + $0x38] sm:$0xff]   ;;  %vm1396_vm7 = vmmov (!%p1137_p5), 0  }
  0x19   : > { %1194 = vmatprep.mubr.msk.bf16.mxu0 %vm1394_vm0, %v1393_v6  ;;  %1240 = vmatprep.mubr.msk.bf16.mxu1 %vm1394_vm0, %v1393_v6  ;;  %v1319_v30 = vld [vmem:[%s1472_s20] sm:$0xff]   ;;  %v1328_v44 = vld [vmem:[%s1477_s23 + $0x48] sm:$0xff]   ;;  %v1329_v45 = vld [vmem:[%s1477_s23 + $0x50] sm:$0xff]  }
  0x1a   : > { %v1505_v9 = vand.u32 3, %v408_v8  ;;  %v1323_v34 = vld [vmem:[%s1472_s20 + $0x20] sm:$0xff]   ;;  %v1330_v46 = vld [vmem:[%s1477_s23 + $0x58] sm:$0xff]   ;;  %v1332_v48 = vld [vmem:[%s1477_s23 + $0x68] sm:$0xff]  }
  0x1b   : > { %1312 = vset.pattern.permute.xlu0 %v1391_v4  ;;  %1314 = vset.pattern.permute.xlu1 %v1392_v5  ;;  %v1327_v43 = vld [vmem:[%s1477_s23 + $0x40] sm:$0xff]   ;;  %v1333_v51 = vld [vmem:[%s1477_s23 + $0x70] sm:$0xff]   ;;  %v1334_v54 = vld [vmem:[%s1477_s23 + $0x78] sm:$0xff]  }
  0x1c   : > { %430 = vperm.xlu0 %1312, %v1491_v1   ;;  %446 = vperm.xlu1 %1314, %v1491_v1   ;;  %vm421_vm1 = vcmp.eq.s32.totalorder %v1505_v9, 2  ;;  %vm434_vm2 = vcmp.eq.s32.totalorder %v1505_v9, 1  ;;  %vm442_vm3 = vcmp.eq.s32.totalorder %v1505_v9, 0  ;;  %v1331_v47 = vld [vmem:[%s1477_s23 + $0x60] sm:$0xff]   ;;  %v1338_v4 = vld [vmem:[%s1477_s23 + $0x18] sm:$0xff]   ;;  %v1340_v7 = vld [vmem:[%s1477_s23 + $0x28] sm:$0xff]  }
  0x1d   : > { %1225 = vmatpush3.bf16.msra.mxu1 %v1327_v43  ;;  %v1335_v63 = vld [vmem:[%s1477_s23] sm:$0xff]   ;;  %v1341_v8 = vld [vmem:[%s1477_s23 + $0x30] sm:$0xff]   ;;  %v1342_v9 = vld [vmem:[%s1477_s23 + $0x38] sm:$0xff]  }
  0x1e   : > { %1226 = vmatprep.subr.bf16.mxu1 %v1393_v6 }
  0x20   : > { %1315 = vset.pattern.permute.xlu1 %v1389_v2  ;;  %v1336_v2 = vld [vmem:[%s1477_s23 + $0x8] sm:$0xff]  }
  0x21   : > { %1227 = vmatpush3.bf16.msra.mxu1 %v1328_v44 }
  0x22   : > { %1228 = vmatprep.subr.bf16.mxu1 %v1393_v6 }
  0x25   : > { %1229 = vmatpush3.bf16.msra.mxu1 %v1329_v45 }
  0x26   : > { %1230 = vmatprep.subr.bf16.mxu1 %v1393_v6 }
  0x29   : > { %1231 = vmatpush3.bf16.msra.mxu1 %v1330_v46 }
  0x2a   : > { %1232 = vmatprep.subr.bf16.mxu1 %v1393_v6 }
  0x2d   : > { %1233 = vmatpush3.bf16.msra.mxu1 %v1331_v47 }
  0x2e   : > { %1234 = vmatprep.subr.bf16.mxu1 %v1393_v6 }
  0x31   : > { %1235 = vmatpush3.bf16.msra.mxu1 %v1332_v48 }
  0x32   : > { %1236 = vmatprep.subr.bf16.mxu1 %v1393_v6 }
  0x35   : > { %1237 = vmatpush3.bf16.msra.mxu1 %v1333_v51 }
  0x36   : > { %1238 = vmatprep.subr.bf16.mxu1 %v1393_v6 }
  0x39   : > { %1239 = vmatpush3.bf16.msra.mxu1 %v1334_v54 }
  0x3a   : > { %1244 = vmatprep.subr.bf16.mxu1 %v1393_v6 }
  0x96   : > { %v427_v10 = vpop.permute.xlu0 %426  ;;  %v439_v11 = vpop.permute.xlu1 %438 }
  0x9b   : > { %v431_v12 = vpop.permute.xlu0 %430  ;;  %v447_v13 = vpop.permute.xlu1 %446 }
  0x9c   : > { %v433_v14 = vsel %vm421_vm1, %v427_v10, %v431_v12  ;;  %v1136_v12 = vld [vmem:[%s393_s29] ss:$0 sm:$0xff] }
  0x9d   : > { %v441_v15 = vsel %vm434_vm2, %v439_v11, %v433_v14  ;;  %v1135_v11 = vld [vmem:[%s390_s26] ss:$0 sm:$0xff] }
  0x9e   : > { %v449_v16 = vsel %vm442_vm3, %v447_v13, %v441_v15  ;;  %v895_v13 = vmul.f32 %v1135_v11, %v1491_v1  ;;  %v1344_v1 = vld [vmem:[%s1663_s8 + $0x8] sm:$0xff] (!%p1137_p5)  }
  0x9f   : > { %v450_v17 = vpack.c.bf16 %v449_v16, %v449_v16 }
  0xa1   : > { %v462_v18 = vsel %vm460_vm4, %v450_v17, 0 }
  0xa2   : > { %1193 = vmatpush3.bf16.msra.mxu0 %v462_v18 }
  0xa3   : > { %1198 = vmatprep.subr.bf16.mxu0 %v1393_v6 }
  0xa5   : > { %1195 = vmatmul.mubr.msk.bf16.vlgmr.msra.gmra.mrb[0].mxu0 %vm456_vm5, %v1318_v19  ;;  %v1343_v19 = vld [vmem:[%s1663_s8] sm:$0xff] (!%p1137_p5)  }
  0xa6   : > { %1200 = vmatprep.mubr.msk.bf16.mxu0 %vm1394_vm0, %v1393_v6 }
 0x178   : > { %v498_v21 = vpop.f32.mrb[0].mxu0 }
 0x179   : > { %v1196_v23 = vpop.f32.mrb[1].mxu0  ;;  %v505_v25 = vmul.f32 %v498_v21, %v405_v20  ;;  %v1395_v20 = vmov (!%p1137_p5), 0.0  }
 0x17a   : > { %v501_v24 = vpop.f32.mrb[2].mxu0 }
 0x17b   : > { %v506_v26 = vmul.f32 %v501_v24, %v406_v22  ;;  %v1197_v27 = vpop.f32.mrb[3].mxu0  ;;  %v1345_v22 = vld [vmem:[%s1663_s8 + $0x10] sm:$0xff] (!%p1137_p5)   ;;  %v1346_v24 = vld [vmem:[%s1663_s8 + $0x18] sm:$0xff] (!%p1137_p5)  }
 0x17d   : > { %v507_v28 = vpack.c.bf16 %v506_v26, %v505_v25  ;;  %v1347_v26 = vld [vmem:[%s1663_s8 + $0x20] sm:$0xff] (!%p1137_p5)  }
 0x17f   : > { %1199 = vmatpush3.bf16.msra.mxu0 %v507_v28  ;;  %v1348_v28 = vld [vmem:[%s1663_s8 + $0x28] sm:$0xff] (!%p1137_p5)  }
 0x180   : > { %1204 = vmatprep.subr.bf16.mxu0 %v1393_v6 }
 0x182   : > { %1201 = vmatmul.mubr.msk.bf16.vlgmr.msra.gmra.mrb[4].mxu0 %vm508_vm6, %v404_v29 }
 0x183   : > { %1205 = vmatpush3.bf16.msra.mxu0 %v1319_v30  ;;  %1220 = vmatprep.mubr.msk.bf16.mxu0 %vm1394_vm0, %v1393_v6  ;;  %v1349_v30 = vld [vmem:[%s1663_s8 + $0x30] sm:$0xff] (!%p1137_p5)  }
 0x184   : > { %1206 = vmatprep.subr.bf16.mxu0 %v1393_v6 }
 0x187   : > { %1207 = vmatpush3.bf16.msra.mxu0 %v1320_v31 }
 0x188   : > { %1208 = vmatprep.subr.bf16.mxu0 %v1393_v6 }
 0x18b   : > { %1209 = vmatpush3.bf16.msra.mxu0 %v1321_v32  ;;  %v1350_v32 = vld [vmem:[%s1663_s8 + $0x38] sm:$0xff] (!%p1137_p5)  }
 0x18c   : > { %1210 = vmatprep.subr.bf16.mxu0 %v1393_v6 }
 0x18f   : > { %1211 = vmatpush3.bf16.msra.mxu0 %v1322_v33 }
 0x190   : > { %1212 = vmatprep.subr.bf16.mxu0 %v1393_v6 }
 0x193   : > { %1213 = vmatpush3.bf16.msra.mxu0 %v1323_v34  ;;  %v933_v34 = vld [vmem:[%s1664_s9] sm:$0x1] (!%p1137_p5) }
 0x194   : > { %1214 = vmatprep.subr.bf16.mxu0 %v1393_v6 }
 0x197   : > { %1215 = vmatpush3.bf16.msra.mxu0 %v1324_v35 }
 0x198   : > { %1216 = vmatprep.subr.bf16.mxu0 %v1393_v6 }
 0x19b   : > { %1217 = vmatpush3.bf16.msra.mxu0 %v1325_v36 }
 0x19c   : > { %1218 = vmatprep.subr.bf16.mxu0 %v1393_v6 }
 0x19f   : > { %1219 = vmatpush3.bf16.msra.mxu0 %v1326_v37 }
 0x1a0   : > { %1264 = vmatprep.subr.bf16.mxu0 (!%p1137_p5), %v1395_v20 }
 0x255   : > { %v546_v38 = vpop.f32.mrb[4].mxu0 }
 0x256   : > { %v552_v39 = vpack.c.bf16 %v546_v38, %v546_v38  ;;  %v1202_v40 = vpop.f32.mrb[5].mxu0 }
 0x257   : > { %v549_v41 = vpop.f32.mrb[6].mxu0 }
 0x258   : > { %1221 = vmatmul.mubr.bf16.vlgmr.msra.gmra.mrb[8].mxu0 %v552_v39  ;;  %v1203_v42 = vpop.f32.mrb[7].mxu0 }
 0x259   : > { %1265 = vmatpush3.bf16.msra.mxu0 (!%p1137_p5), %v1343_v19  ;;  %1280 = vmatprep.mubr.msk.bf16.mxu0 (!%p1137_p5), %vm1396_vm7, %v1395_v20 }
 0x25a   : > { %1266 = vmatprep.subr.bf16.mxu0 (!%p1137_p5), %v1395_v20 }
 0x25d   : > { %1267 = vmatpush3.bf16.msra.mxu0 (!%p1137_p5), %v1344_v1 }
 0x25e   : > { %1268 = vmatprep.subr.bf16.mxu0 (!%p1137_p5), %v1395_v20 }
 0x261   : > { %1269 = vmatpush3.bf16.msra.mxu0 (!%p1137_p5), %v1345_v22 }
 0x262   : > { %1270 = vmatprep.subr.bf16.mxu0 (!%p1137_p5), %v1395_v20 }
 0x265   : > { %1271 = vmatpush3.bf16.msra.mxu0 (!%p1137_p5), %v1346_v24 }
 0x266   : > { %1272 = vmatprep.subr.bf16.mxu0 (!%p1137_p5), %v1395_v20 }
 0x269   : > { %1273 = vmatpush3.bf16.msra.mxu0 (!%p1137_p5), %v1347_v26 }
 0x26a   : > { %1274 = vmatprep.subr.bf16.mxu0 (!%p1137_p5), %v1395_v20 }
 0x26d   : > { %1275 = vmatpush3.bf16.msra.mxu0 (!%p1137_p5), %v1348_v28 }
 0x26e   : > { %1276 = vmatprep.subr.bf16.mxu0 (!%p1137_p5), %v1395_v20 }
 0x271   : > { %1277 = vmatpush3.bf16.msra.mxu0 (!%p1137_p5), %v1349_v30 }
 0x272   : > { %1278 = vmatprep.subr.bf16.mxu0 (!%p1137_p5), %v1395_v20 }
 0x275   : > { %1279 = vmatpush3.bf16.msra.mxu0 (!%p1137_p5), %v1350_v32 }
 0x32b   : > { %v651_v49 = vpop.f32.mrb[8].mxu0 }
 0x32c   : > { %680 = vperm.xlu0 %1312, %v651_v49   ;;  %676 = vperm.xlu1 %1315, %v651_v49   ;;  %v1222_v50 = vpop.f32.mrb[9].mxu0  ;;  %v657_v10 = vpack.c.bf16 %v651_v49, %v651_v49 }
 0x32d   : > { %v654_v52 = vpop.f32.mrb[10].mxu0 }
 0x32e   : > { %v1223_v53 = vpop.f32.mrb[11].mxu0 }
 0x330   : > { %1317 = vset.pattern.permute.xlu0 %v1392_v5  ;;  %1316 = vset.pattern.permute.xlu1 %v1390_v3  ;;  %v1337_v3 = vld [vmem:[%s1477_s23 + $0x10] sm:$0xff]   ;;  %v1339_v5 = vld [vmem:[%s1477_s23 + $0x20] sm:$0xff]  }
 0x331   : > { %690 = vperm.xlu0 %1317, %v651_v49   ;;  %685 = vperm.xlu1 %1316, %v651_v49  }
 0x3ab   : > { %v681_v55 = vpop.permute.xlu0 %680  ;;  %v677_v56 = vpop.permute.xlu1 %676 }
 0x3ac   : > { %v683_v57 = vsel %vm421_vm1, %v677_v56, %v681_v55 }
 0x3b0   : > { %v691_v58 = vpop.permute.xlu0 %690  ;;  %v686_v59 = vpop.permute.xlu1 %685 }
 0x3b1   : > { %v688_v60 = vsel %vm434_vm2, %v686_v59, %v683_v57 }
 0x3b2   : > { %v693_v61 = vsel %vm442_vm3, %v691_v58, %v688_v60 }
 0x3b3   : > { %v694_v62 = vmul.f32 %v693_v61, %v651_v49 }
 0x3b5   : > { %v695_v0 = vpack.c.bf16 %v694_v62, %v694_v62 }
 0x3b7   : > { %1241 = vmatmul.mubr.bf16.vlgmr.msra.gmra.mrb[0].mxu1 %v695_v0 }
 0x3b8   : > { %1245 = vmatpush3.bf16.msra.mxu1 %v1335_v63  ;;  %1260 = vmatprep.mubr.msk.bf16.mxu1 %vm1394_vm0, %v1393_v6 }
 0x3b9   : > { %1246 = vmatprep.subr.bf16.mxu1 %v1393_v6 }
 0x3bc   : > { %1247 = vmatpush3.bf16.msra.mxu1 %v1336_v2 }
 0x3bd   : > { %1248 = vmatprep.subr.bf16.mxu1 %v1393_v6 }
 0x3c0   : > { %1249 = vmatpush3.bf16.msra.mxu1 %v1337_v3 }
 0x3c1   : > { %1250 = vmatprep.subr.bf16.mxu1 %v1393_v6 }
 0x3c4   : > { %1251 = vmatpush3.bf16.msra.mxu1 %v1338_v4 }
 0x3c5   : > { %1252 = vmatprep.subr.bf16.mxu1 %v1393_v6 }
 0x3c8   : > { %1253 = vmatpush3.bf16.msra.mxu1 %v1339_v5 }
 0x3c9   : > { %1254 = vmatprep.subr.bf16.mxu1 %v1393_v6 }
 0x3cc   : > { %1255 = vmatpush3.bf16.msra.mxu1 %v1340_v7 }
 0x3cd   : > { %1256 = vmatprep.subr.bf16.mxu1 %v1393_v6 }
 0x3d0   : > { %1257 = vmatpush3.bf16.msra.mxu1 %v1341_v8 }
 0x3d1   : > { %1258 = vmatprep.subr.bf16.mxu1 %v1393_v6 }
 0x3d4   : > { %1259 = vmatpush3.bf16.msra.mxu1 %v1342_v9 }
 0x3d7   : > { %1261 = vmatmul.mubr.bf16.vlgmr.msra.gmra.mrb[0].mxu1 %v657_v10 }
 0x4a9   : > { %909 = sbr.rel (%p1137_p5) target bundleno = 1428 (0x594), region = 68 }
 0x4aa   : > { %v882_v14 = vpop.f32.mrb[0].mxu1 }
 0x4ab   : > { %v903_v15 = vmul.f32 %v1136_v12, %v882_v14  ;;  %v1262_v16 = vpop.f32.mrb[1].mxu1 }
 0x4ac   : > { %v885_v17 = vpop.f32.mrb[2].mxu1 }
 0x4ad   : > { %v904_v6 = vadd.f32 %v903_v15, %v895_v13  ;;  %v1263_v18 = vpop.f32.mrb[3].mxu1 }
 0x4af   : > { %905 = vst [vmem:[#allocation2] sm:$0xff] %v904_v6  ;;  %v910_v21 = vrot.slane (!%p1137_p5), %v904_v6, 4 }
 0x4b1   : > { %v911_v23 = vadd.f32 %v910_v21, %v904_v6 }
 0x4b3   : > { %v912_v25 = vrot.slane %v911_v23, 2 }
 0x4b5   : > { %v913_v27 = vadd.f32 %v912_v25, %v911_v23 }
 0x4b7   : > { %v914_v29 = vrot.slane %v913_v27, 1 }
 0x4b9   : > { %v915_v31 = vadd.f32 %v914_v29, %v913_v27 }
 0x4bb   : > { %v916_v33 = vpack.c.bf16 %v915_v31, %v915_v31 }
 0x4bd   : > { %1281 = vmatmul.mubr.bf16.vlgmr.msra.gmra.mrb[0].mxu0 %v916_v33 }
 0x590   : > { %v1016_v35 = vpop.f32.mrb[0].mxu0 }
 0x591   : > { %v1017_v36 = vadd.f32 %v1016_v35, %v933_v34  ;;  %v1282_v37 = vpop.f32.mrb[1].mxu0 }
 0x592   : > { %v1019_v38 = vpop.f32.mrb[2].mxu0 }
 0x593   : > { %1022 = vst [vmem:[#allocation3] sm:$0x1] %v1017_v36  ;;  %v1283_v39 = vpop.f32.mrb[3].mxu0 }
 0x594 PF: > { %p1292_p6 = scmp.eq.s32.totalorder %s1459_s14, 1  ;;  %s1397_s23 = smov [#allocation3]  }
 0x595   : > { %s1030_s30 = sshll.u32 %s1397_s23, 4  ;;  %s1031_s30 = int_to_ptr.vmem [resolvable:$true] %s1030_s30 }
 0x596   : > { %s1351_s15 = scalar_lea.vmem %s1031_s30, 16  ;;  %s1357_s26 = scalar_lea.vmem %s1031_s30, 32 }
 0x597   : > { %p1352_p7 = scmp.ne.s32.totalorder %s1031_s30, %s1351_s15  ;;  %p1358_p10 = scmp.lt.s32.totalorder %s1031_s30, %s1031_s30 }
 0x598   : > { %p1359_p11 = scmp.lt.s32.totalorder %s1357_s26, %s1351_s15 }
 0x599   : > { %p1353_p8 = pnand %p1352_p7, %p1292_p6 }
 0x59a   : > { %p1360_p12 = por %p1359_p11, %p1358_p10 }
 0x59b   : > { %p1354_p9 = pneg %p1353_p8 }
 0x59d   : > { %p1361_p13 = pnand %p1360_p12, %p1354_p9 }
 0x59f   : > { %1364 = shalt.err (!%p1361_p13)
}
 0x5a0   : > { %s1365_s12 = scalar_lea.hbm %s1665_s10, 16 }
 0x5a1   : > { %p1366_p0 = scmp.ne.s32.totalorder %s1665_s10, %s1365_s12  ;;  %p1371_p3 = scmp.lt.u32.totalorder %s1365_s12, %s1665_s10 }
 0x5a3   : > { %p1367_p1 = pnand %p1366_p0, %p1292_p6 }
 0x5a5   : > { %p1368_p2 = pneg %p1367_p1 }
 0x5a7   : > { %p1373_p4 = pnand %p1371_p3, %p1368_p2 }
 0x5a9   : > { %1376 = shalt.err (!%p1373_p4)
}
 0x5aa   : > { %1289 = dma.vmem_to_hbm [thread:$0]  (%p1292_p6), %s1031_s30, 16, %s1665_s10, [#allocation4]  }
 0x5ab   : > { %1382 = dma.done.wait (%p1292_p6), [#allocation4], 16  }
 0x5ac   : > { %1384 = vsyncadd (%p1292_p6), [#allocation4], 4294967280 }
 0x5ad PF: > { %s21_s13 = sadd.s32 1, %s1387_s13  }
 0x5ae   : > { %p18_p5 = scmp.ge.s32.totalorder %s21_s13, 4  }
 0x5b0   :  { %20 = sbr.rel (!%p18_p5) target bundleno = 1 (0x1), region = 104 }
 0x5b7   :  { %1043 = vsyncpa [#allocation4], 1 }
 0x5b8   :  { %1045 = vsyncpa [#allocation4 + $0x1], 1 }

</bundles_post_ra>
